<compile_context>
chip_gen: v7x
topology: tpu7x:2x2x1
jax: 0.10.0
libtpu: 0.0.40
codegen_flags: <defaults>
</compile_context>

<pallas_src>
import functools

import jax
import jax.numpy as jnp
from jax import lax
from jax.experimental import pallas as pl
from jax.experimental.pallas import tpu as pltpu


def _weather_lstm_kernel(x_ref, wih_ref, whh_ref, b_ref, wfc_ref, bfc_ref,
                         out_ref, *, B, T):
    """Single-invocation LSTM + FC.

    x_ref   : (T*B, I)    time-major, pre-flattened input (whole sequence, VMEM)
    wih_ref : (I, 4H)     W_ih^T
    whh_ref : (H, 4H)     W_hh^T
    b_ref   : (1, 4H)     b_ih + b_hh
    wfc_ref : (H, O)      W_fc^T
    bfc_ref : (1, O)      b_fc
    out_ref : (B, O)      output (last-timestep hidden state through the FC)
    """
    H = whh_ref.shape[0]
    G = 4 * H

    # ---- Prologue: input projection for ALL timesteps (off the recurrence) ----
    # (T*B, I) @ (I, 4H) + bias, one MXU call.  Rows are time-major, so step t
    # owns the contiguous row block [t*B, (t+1)*B).
    x_proj = (jnp.dot(x_ref[...], wih_ref[...],
                      preferred_element_type=jnp.float32) + b_ref[...])   # (T*B, 4H)

    w_hh = whh_ref[...]                                                    # (H, 4H)

    # Lane mask picking the 'g' gate columns (tanh); others use sigmoid.
    # Hoisted out of the loop (JAX does not CSE broadcast/iota inside loops).
    lane = lax.broadcasted_iota(jnp.int32, (B, G), 1)
    g_mask = jnp.logical_and(lane >= 2 * H, lane < 3 * H)
    # Pre-scale: tanh lanes keep x, sigmoid lanes use x/2 (sigmoid(x)=0.5*tanh(x/2)+0.5).
    arg_scale = jnp.where(g_mask, jnp.float32(1.0), jnp.float32(0.5))

    h = jnp.zeros((B, H), jnp.float32)
    c = jnp.zeros((B, H), jnp.float32)

    # ---- Recurrence: fully unrolled; only h @ W_hh is on the critical path ----
    for t in range(T):  # T is a small static int -> static slices, no scf loop
        gates = x_proj[t * B:(t + 1) * B, :] + jnp.dot(
            h, w_hh, preferred_element_type=jnp.float32)                  # (B, 4H)
        # ONE full-width EUP transcendental per step; sigmoid recovered on the
        # VPU (free filler) via 0.5*t + 0.5.
        t_all = jnp.tanh(gates * arg_scale)
        acts = jnp.where(g_mask, t_all, 0.5 * t_all + 0.5)
        i_g = acts[:, 0 * H:1 * H]
        f_g = acts[:, 1 * H:2 * H]
        g_g = acts[:, 2 * H:3 * H]
        o_g = acts[:, 3 * H:4 * H]
        c = f_g * c + i_g * g_g
        h = o_g * jnp.tanh(c)

    # ---- Final Linear on the last hidden state (single store) ----------------
    out_ref[...] = (jnp.dot(h, wfc_ref[...], preferred_element_type=jnp.float32)
                    + bfc_ref[...]).astype(out_ref.dtype)


@jax.jit
def weather_lstm_forward(x, w_ih, w_hh, b_ih, b_hh, w_fc, b_fc):
    """x: (B, T, I) float32 (batch_first, same as the PyTorch module)."""
    B, T, I = x.shape
    H = w_hh.shape[1]
    O = w_fc.shape[0]

    # Weight/input prep (tiny fused XLA ops): pre-transpose weights for
    # row-major (B, K) @ (K, N) MXU matmuls, fuse the two LSTM biases, and
    # reorder x to time-major flattened rows so the kernel's per-step read is a
    # static whole-vreg slice.
    x_tm = jnp.transpose(x, (1, 0, 2)).reshape(T * B, I)   # (T*B, I)
    w_ih_t = jnp.transpose(w_ih)                            # (I, 4H)
    w_hh_t = jnp.transpose(w_hh)                            # (H, 4H)
    b = (b_ih + b_hh).reshape(1, 4 * H)                     # (1, 4H)
    w_fc_t = jnp.transpose(w_fc)                            # (H, O)
    b_fc2 = b_fc.reshape(1, O)                              # (1, O)

    vmem_spec = lambda: pl.BlockSpec(memory_space=pltpu.MemorySpace.VMEM)

    kernel = functools.partial(_weather_lstm_kernel, B=B, T=T)
    return pl.pallas_call(
        kernel,
        out_shape=jax.ShapeDtypeStruct((B, O), jnp.float32),
        in_specs=[vmem_spec() for _ in range(6)],
        out_specs=vmem_spec(),
    )(x_tm, w_ih_t, w_hh_t, b, w_fc_t, b_fc2)


def reference_forward(x, w_ih, w_hh, b_ih, b_hh, w_fc, b_fc):
    """Pure-JAX reference matching PyTorch nn.LSTM semantics."""
    B, T, I = x.shape
    H = w_hh.shape[1]

    def step(carry, x_t):
        h, c = carry
        gates = x_t @ w_ih.T + h @ w_hh.T + b_ih + b_hh
        i_g = jax.nn.sigmoid(gates[:, 0 * H:1 * H])
        f_g = jax.nn.sigmoid(gates[:, 1 * H:2 * H])
        g_g = jnp.tanh(gates[:, 2 * H:3 * H])
        o_g = jax.nn.sigmoid(gates[:, 3 * H:4 * H])
        c = f_g * c + i_g * g_g
        h = o_g * jnp.tanh(c)
        return (h, c), None

    h0 = jnp.zeros((B, H), jnp.float32)
    c0 = jnp.zeros((B, H), jnp.float32)
    (h_last, _), _ = lax.scan(step, (h0, c0), jnp.transpose(x, (1, 0, 2)))
    return h_last @ w_fc.T + b_fc


if __name__ == "__main__":
    # Small shapes consistent with the module's forward.
    B, T = 8, 8            # batch, sequence length
    INPUT_SIZE = 4         # weather features
    HIDDEN_SIZE = 32
    OUTPUT_SIZE = 4

    key = jax.random.PRNGKey(0)
    ks = jax.random.split(key, 8)
    bound = 1.0 / jnp.sqrt(HIDDEN_SIZE)  # PyTorch default uniform init bound

    x = jax.random.normal(ks[0], (B, T, INPUT_SIZE), dtype=jnp.float32)
    w_ih = jax.random.uniform(ks[1], (4 * HIDDEN_SIZE, INPUT_SIZE),
                              minval=-bound, maxval=bound, dtype=jnp.float32)
    w_hh = jax.random.uniform(ks[2], (4 * HIDDEN_SIZE, HIDDEN_SIZE),
                              minval=-bound, maxval=bound, dtype=jnp.float32)
    b_ih = jax.random.uniform(ks[3], (4 * HIDDEN_SIZE,),
                              minval=-bound, maxval=bound, dtype=jnp.float32)
    b_hh = jax.random.uniform(ks[4], (4 * HIDDEN_SIZE,),
                              minval=-bound, maxval=bound, dtype=jnp.float32)
    w_fc = jax.random.uniform(ks[5], (OUTPUT_SIZE, HIDDEN_SIZE),
                              minval=-bound, maxval=bound, dtype=jnp.float32)
    b_fc = jax.random.uniform(ks[6], (OUTPUT_SIZE,),
                              minval=-bound, maxval=bound, dtype=jnp.float32)

    out = weather_lstm_forward(x, w_ih, w_hh, b_ih, b_hh, w_fc, b_fc)
    out = jax.block_until_ready(out)

    ref = reference_forward(x, w_ih, w_hh, b_ih, b_hh, w_fc, b_fc)
    assert out.shape == (B, OUTPUT_SIZE)
    err = jnp.max(jnp.abs(out - ref))
    assert jnp.allclose(out, ref, atol=2e-5, rtol=2e-5), f"max abs err {err}"

    print("KERNEL_OK")
</pallas_src>

<mosaic_0001>
module attributes {stable_mosaic.version = 11 : i64} {
  func.func @_weather_lstm_kernel(%arg0: memref<64x4xf32, #tpu.memory_space<vmem>>, %arg1: memref<4x128xf32, #tpu.memory_space<vmem>>, %arg2: memref<32x128xf32, #tpu.memory_space<vmem>>, %arg3: memref<1x128xf32, #tpu.memory_space<vmem>>, %arg4: memref<32x4xf32, #tpu.memory_space<vmem>>, %arg5: memref<1x4xf32, #tpu.memory_space<vmem>>, %arg6: memref<8x4xf32, #tpu.memory_space<vmem>>) attributes {dimension_semantics = [], scalar_prefetch = 0 : i64, scratch_operands = 0 : i64, tpu.core_type = #tpu.core_type<tc>} {
    %c0 = arith.constant 0 : index
    %c0_0 = arith.constant 0 : index
    %0 = vector.load %arg0[%c0, %c0_0] : memref<64x4xf32, #tpu.memory_space<vmem>>, vector<64x4xf32>
    %c0_1 = arith.constant 0 : index
    %c0_2 = arith.constant 0 : index
    %1 = vector.load %arg1[%c0_1, %c0_2] : memref<4x128xf32, #tpu.memory_space<vmem>>, vector<4x128xf32>
    %cst = arith.constant dense<0.000000e+00> : vector<64x128xf32>
    %2 = tpu.matmul %0, %1, %cst {dimension_numbers = #tpu.dot_dimension_numbers<[1], [0], [0], [1], [0, 0, 1, 1], [], []>} : vector<64x4xf32>, vector<4x128xf32>, vector<64x128xf32> -> vector<64x128xf32>
    %c0_3 = arith.constant 0 : index
    %c0_4 = arith.constant 0 : index
    %3 = vector.load %arg3[%c0_3, %c0_4] : memref<1x128xf32, #tpu.memory_space<vmem>>, vector<1x128xf32>
    %4 = vector.broadcast %3 : vector<1x128xf32> to vector<64x128xf32>
    %5 = arith.addf %2, %4 : vector<64x128xf32>
    %c0_5 = arith.constant 0 : index
    %c0_6 = arith.constant 0 : index
    %6 = vector.load %arg2[%c0_5, %c0_6] : memref<32x128xf32, #tpu.memory_space<vmem>>, vector<32x128xf32>
    %7 = tpu.iota {dimensions = array<i32: 1>} : vector<8x128xi32>
    %c64_i32 = arith.constant 64 : i32
    %8 = vector.broadcast %c64_i32 : i32 to vector<8x128xi32>
    %9 = arith.cmpi sge, %7, %8 : vector<8x128xi32>
    %c96_i32 = arith.constant 96 : i32
    %10 = vector.broadcast %c96_i32 : i32 to vector<8x128xi32>
    %11 = arith.cmpi slt, %7, %10 : vector<8x128xi32>
    %12 = arith.andi %9, %11 : vector<8x128xi1>
    %cst_7 = arith.constant 1.000000e+00 : f32
    %cst_8 = arith.constant 5.000000e-01 : f32
    %13 = vector.broadcast %cst_7 : f32 to vector<8x128xf32>
    %14 = vector.broadcast %cst_8 : f32 to vector<8x128xf32>
    %15 = arith.select %12, %13, %14 : vector<8x128xi1>, vector<8x128xf32>
    %cst_9 = arith.constant 0.000000e+00 : f32
    %16 = vector.broadcast %cst_9 : f32 to vector<8x32xf32>
    %cst_10 = arith.constant 0.000000e+00 : f32
    %17 = vector.broadcast %cst_10 : f32 to vector<8x32xf32>
    %18 = vector.extract_strided_slice %5 {offsets = [0, 0], sizes = [8, 128], strides = [1, 1]} : vector<64x128xf32> to vector<8x128xf32>
    %cst_11 = arith.constant dense<0.000000e+00> : vector<8x128xf32>
    %19 = tpu.matmul %16, %6, %cst_11 {dimension_numbers = #tpu.dot_dimension_numbers<[1], [0], [0], [1], [0, 0, 1, 1], [], []>} : vector<8x32xf32>, vector<32x128xf32>, vector<8x128xf32> -> vector<8x128xf32>
    %20 = arith.addf %18, %19 : vector<8x128xf32>
    %21 = arith.mulf %20, %15 : vector<8x128xf32>
    %22 = math.tanh %21 : vector<8x128xf32>
    %cst_12 = arith.constant 5.000000e-01 : f32
    %23 = vector.broadcast %cst_12 : f32 to vector<8x128xf32>
    %24 = arith.mulf %23, %22 : vector<8x128xf32>
    %cst_13 = arith.constant 5.000000e-01 : f32
    %25 = vector.broadcast %cst_13 : f32 to vector<8x128xf32>
    %26 = arith.addf %24, %25 : vector<8x128xf32>
    %27 = arith.select %12, %22, %26 : vector<8x128xi1>, vector<8x128xf32>
    %28 = vector.extract_strided_slice %27 {offsets = [0, 0], sizes = [8, 32], strides = [1, 1]} : vector<8x128xf32> to vector<8x32xf32>
    %29 = vector.extract_strided_slice %27 {offsets = [0, 32], sizes = [8, 32], strides = [1, 1]} : vector<8x128xf32> to vector<8x32xf32>
    %30 = vector.extract_strided_slice %27 {offsets = [0, 64], sizes = [8, 32], strides = [1, 1]} : vector<8x128xf32> to vector<8x32xf32>
    %31 = vector.extract_strided_slice %27 {offsets = [0, 96], sizes = [8, 32], strides = [1, 1]} : vector<8x128xf32> to vector<8x32xf32>
    %32 = arith.mulf %29, %17 : vector<8x32xf32>
    %33 = arith.mulf %28, %30 : vector<8x32xf32>
    %34 = arith.addf %32, %33 : vector<8x32xf32>
    %35 = math.tanh %34 : vector<8x32xf32>
    %36 = arith.mulf %31, %35 : vector<8x32xf32>
    %37 = vector.extract_strided_slice %5 {offsets = [8, 0], sizes = [8, 128], strides = [1, 1]} : vector<64x128xf32> to vector<8x128xf32>
    %cst_14 = arith.constant dense<0.000000e+00> : vector<8x128xf32>
    %38 = tpu.matmul %36, %6, %cst_14 {dimension_numbers = #tpu.dot_dimension_numbers<[1], [0], [0], [1], [0, 0, 1, 1], [], []>} : vector<8x32xf32>, vector<32x128xf32>, vector<8x128xf32> -> vector<8x128xf32>
    %39 = arith.addf %37, %38 : vector<8x128xf32>
    %40 = arith.mulf %39, %15 : vector<8x128xf32>
    %41 = math.tanh %40 : vector<8x128xf32>
    %cst_15 = arith.constant 5.000000e-01 : f32
    %42 = vector.broadcast %cst_15 : f32 to vector<8x128xf32>
    %43 = arith.mulf %42, %41 : vector<8x128xf32>
    %cst_16 = arith.constant 5.000000e-01 : f32
    %44 = vector.broadcast %cst_16 : f32 to vector<8x128xf32>
    %45 = arith.addf %43, %44 : vector<8x128xf32>
    %46 = arith.select %12, %41, %45 : vector<8x128xi1>, vector<8x128xf32>
    %47 = vector.extract_strided_slice %46 {offsets = [0, 0], sizes = [8, 32], strides = [1, 1]} : vector<8x128xf32> to vector<8x32xf32>
    %48 = vector.extract_strided_slice %46 {offsets = [0, 32], sizes = [8, 32], strides = [1, 1]} : vector<8x128xf32> to vector<8x32xf32>
    %49 = vector.extract_strided_slice %46 {offsets = [0, 64], sizes = [8, 32], strides = [1, 1]} : vector<8x128xf32> to vector<8x32xf32>
    %50 = vector.extract_strided_slice %46 {offsets = [0, 96], sizes = [8, 32], strides = [1, 1]} : vector<8x128xf32> to vector<8x32xf32>
    %51 = arith.mulf %48, %34 : vector<8x32xf32>
    %52 = arith.mulf %47, %49 : vector<8x32xf32>
    %53 = arith.addf %51, %52 : vector<8x32xf32>
    %54 = math.tanh %53 : vector<8x32xf32>
    %55 = arith.mulf %50, %54 : vector<8x32xf32>
    %56 = vector.extract_strided_slice %5 {offsets = [16, 0], sizes = [8, 128], strides = [1, 1]} : vector<64x128xf32> to vector<8x128xf32>
    %cst_17 = arith.constant dense<0.000000e+00> : vector<8x128xf32>
    %57 = tpu.matmul %55, %6, %cst_17 {dimension_numbers = #tpu.dot_dimension_numbers<[1], [0], [0], [1], [0, 0, 1, 1], [], []>} : vector<8x32xf32>, vector<32x128xf32>, vector<8x128xf32> -> vector<8x128xf32>
    %58 = arith.addf %56, %57 : vector<8x128xf32>
    %59 = arith.mulf %58, %15 : vector<8x128xf32>
    %60 = math.tanh %59 : vector<8x128xf32>
    %cst_18 = arith.constant 5.000000e-01 : f32
    %61 = vector.broadcast %cst_18 : f32 to vector<8x128xf32>
    %62 = arith.mulf %61, %60 : vector<8x128xf32>
    %cst_19 = arith.constant 5.000000e-01 : f32
    %63 = vector.broadcast %cst_19 : f32 to vector<8x128xf32>
    %64 = arith.addf %62, %63 : vector<8x128xf32>
    %65 = arith.select %12, %60, %64 : vector<8x128xi1>, vector<8x128xf32>
    %66 = vector.extract_strided_slice %65 {offsets = [0, 0], sizes = [8, 32], strides = [1, 1]} : vector<8x128xf32> to vector<8x32xf32>
    %67 = vector.extract_strided_slice %65 {offsets = [0, 32], sizes = [8, 32], strides = [1, 1]} : vector<8x128xf32> to vector<8x32xf32>
    %68 = vector.extract_strided_slice %65 {offsets = [0, 64], sizes = [8, 32], strides = [1, 1]} : vector<8x128xf32> to vector<8x32xf32>
    %69 = vector.extract_strided_slice %65 {offsets = [0, 96], sizes = [8, 32], strides = [1, 1]} : vector<8x128xf32> to vector<8x32xf32>
    %70 = arith.mulf %67, %53 : vector<8x32xf32>
    %71 = arith.mulf %66, %68 : vector<8x32xf32>
    %72 = arith.addf %70, %71 : vector<8x32xf32>
    %73 = math.tanh %72 : vector<8x32xf32>
    %74 = arith.mulf %69, %73 : vector<8x32xf32>
    %75 = vector.extract_strided_slice %5 {offsets = [24, 0], sizes = [8, 128], strides = [1, 1]} : vector<64x128xf32> to vector<8x128xf32>
    %cst_20 = arith.constant dense<0.000000e+00> : vector<8x128xf32>
    %76 = tpu.matmul %74, %6, %cst_20 {dimension_numbers = #tpu.dot_dimension_numbers<[1], [0], [0], [1], [0, 0, 1, 1], [], []>} : vector<8x32xf32>, vector<32x128xf32>, vector<8x128xf32> -> vector<8x128xf32>
    %77 = arith.addf %75, %76 : vector<8x128xf32>
    %78 = arith.mulf %77, %15 : vector<8x128xf32>
    %79 = math.tanh %78 : vector<8x128xf32>
    %cst_21 = arith.constant 5.000000e-01 : f32
    %80 = vector.broadcast %cst_21 : f32 to vector<8x128xf32>
    %81 = arith.mulf %80, %79 : vector<8x128xf32>
    %cst_22 = arith.constant 5.000000e-01 : f32
    %82 = vector.broadcast %cst_22 : f32 to vector<8x128xf32>
    %83 = arith.addf %81, %82 : vector<8x128xf32>
    %84 = arith.select %12, %79, %83 : vector<8x128xi1>, vector<8x128xf32>
    %85 = vector.extract_strided_slice %84 {offsets = [0, 0], sizes = [8, 32], strides = [1, 1]} : vector<8x128xf32> to vector<8x32xf32>
    %86 = vector.extract_strided_slice %84 {offsets = [0, 32], sizes = [8, 32], strides = [1, 1]} : vector<8x128xf32> to vector<8x32xf32>
    %87 = vector.extract_strided_slice %84 {offsets = [0, 64], sizes = [8, 32], strides = [1, 1]} : vector<8x128xf32> to vector<8x32xf32>
    %88 = vector.extract_strided_slice %84 {offsets = [0, 96], sizes = [8, 32], strides = [1, 1]} : vector<8x128xf32> to vector<8x32xf32>
    %89 = arith.mulf %86, %72 : vector<8x32xf32>
    %90 = arith.mulf %85, %87 : vector<8x32xf32>
    %91 = arith.addf %89, %90 : vector<8x32xf32>
    %92 = math.tanh %91 : vector<8x32xf32>
    %93 = arith.mulf %88, %92 : vector<8x32xf32>
    %94 = vector.extract_strided_slice %5 {offsets = [32, 0], sizes = [8, 128], strides = [1, 1]} : vector<64x128xf32> to vector<8x128xf32>
    %cst_23 = arith.constant dense<0.000000e+00> : vector<8x128xf32>
    %95 = tpu.matmul %93, %6, %cst_23 {dimension_numbers = #tpu.dot_dimension_numbers<[1], [0], [0], [1], [0, 0, 1, 1], [], []>} : vector<8x32xf32>, vector<32x128xf32>, vector<8x128xf32> -> vector<8x128xf32>
    %96 = arith.addf %94, %95 : vector<8x128xf32>
    %97 = arith.mulf %96, %15 : vector<8x128xf32>
    %98 = math.tanh %97 : vector<8x128xf32>
    %cst_24 = arith.constant 5.000000e-01 : f32
    %99 = vector.broadcast %cst_24 : f32 to vector<8x128xf32>
    %100 = arith.mulf %99, %98 : vector<8x128xf32>
    %cst_25 = arith.constant 5.000000e-01 : f32
    %101 = vector.broadcast %cst_25 : f32 to vector<8x128xf32>
    %102 = arith.addf %100, %101 : vector<8x128xf32>
    %103 = arith.select %12, %98, %102 : vector<8x128xi1>, vector<8x128xf32>
    %104 = vector.extract_strided_slice %103 {offsets = [0, 0], sizes = [8, 32], strides = [1, 1]} : vector<8x128xf32> to vector<8x32xf32>
    %105 = vector.extract_strided_slice %103 {offsets = [0, 32], sizes = [8, 32], strides = [1, 1]} : vector<8x128xf32> to vector<8x32xf32>
    %106 = vector.extract_strided_slice %103 {offsets = [0, 64], sizes = [8, 32], strides = [1, 1]} : vector<8x128xf32> to vector<8x32xf32>
    %107 = vector.extract_strided_slice %103 {offsets = [0, 96], sizes = [8, 32], strides = [1, 1]} : vector<8x128xf32> to vector<8x32xf32>
    %108 = arith.mulf %105, %91 : vector<8x32xf32>
    %109 = arith.mulf %104, %106 : vector<8x32xf32>
    %110 = arith.addf %108, %109 : vector<8x32xf32>
    %111 = math.tanh %110 : vector<8x32xf32>
    %112 = arith.mulf %107, %111 : vector<8x32xf32>
    %113 = vector.extract_strided_slice %5 {offsets = [40, 0], sizes = [8, 128], strides = [1, 1]} : vector<64x128xf32> to vector<8x128xf32>
    %cst_26 = arith.constant dense<0.000000e+00> : vector<8x128xf32>
    %114 = tpu.matmul %112, %6, %cst_26 {dimension_numbers = #tpu.dot_dimension_numbers<[1], [0], [0], [1], [0, 0, 1, 1], [], []>} : vector<8x32xf32>, vector<32x128xf32>, vector<8x128xf32> -> vector<8x128xf32>
    %115 = arith.addf %113, %114 : vector<8x128xf32>
    %116 = arith.mulf %115, %15 : vector<8x128xf32>
    %117 = math.tanh %116 : vector<8x128xf32>
    %cst_27 = arith.constant 5.000000e-01 : f32
    %118 = vector.broadcast %cst_27 : f32 to vector<8x128xf32>
    %119 = arith.mulf %118, %117 : vector<8x128xf32>
    %cst_28 = arith.constant 5.000000e-01 : f32
    %120 = vector.broadcast %cst_28 : f32 to vector<8x128xf32>
    %121 = arith.addf %119, %120 : vector<8x128xf32>
    %122 = arith.select %12, %117, %121 : vector<8x128xi1>, vector<8x128xf32>
    %123 = vector.extract_strided_slice %122 {offsets = [0, 0], sizes = [8, 32], strides = [1, 1]} : vector<8x128xf32> to vector<8x32xf32>
    %124 = vector.extract_strided_slice %122 {offsets = [0, 32], sizes = [8, 32], strides = [1, 1]} : vector<8x128xf32> to vector<8x32xf32>
    %125 = vector.extract_strided_slice %122 {offsets = [0, 64], sizes = [8, 32], strides = [1, 1]} : vector<8x128xf32> to vector<8x32xf32>
    %126 = vector.extract_strided_slice %122 {offsets = [0, 96], sizes = [8, 32], strides = [1, 1]} : vector<8x128xf32> to vector<8x32xf32>
    %127 = arith.mulf %124, %110 : vector<8x32xf32>
    %128 = arith.mulf %123, %125 : vector<8x32xf32>
    %129 = arith.addf %127, %128 : vector<8x32xf32>
    %130 = math.tanh %129 : vector<8x32xf32>
    %131 = arith.mulf %126, %130 : vector<8x32xf32>
    %132 = vector.extract_strided_slice %5 {offsets = [48, 0], sizes = [8, 128], strides = [1, 1]} : vector<64x128xf32> to vector<8x128xf32>
    %cst_29 = arith.constant dense<0.000000e+00> : vector<8x128xf32>
    %133 = tpu.matmul %131, %6, %cst_29 {dimension_numbers = #tpu.dot_dimension_numbers<[1], [0], [0], [1], [0, 0, 1, 1], [], []>} : vector<8x32xf32>, vector<32x128xf32>, vector<8x128xf32> -> vector<8x128xf32>
    %134 = arith.addf %132, %133 : vector<8x128xf32>
    %135 = arith.mulf %134, %15 : vector<8x128xf32>
    %136 = math.tanh %135 : vector<8x128xf32>
    %cst_30 = arith.constant 5.000000e-01 : f32
    %137 = vector.broadcast %cst_30 : f32 to vector<8x128xf32>
    %138 = arith.mulf %137, %136 : vector<8x128xf32>
    %cst_31 = arith.constant 5.000000e-01 : f32
    %139 = vector.broadcast %cst_31 : f32 to vector<8x128xf32>
    %140 = arith.addf %138, %139 : vector<8x128xf32>
    %141 = arith.select %12, %136, %140 : vector<8x128xi1>, vector<8x128xf32>
    %142 = vector.extract_strided_slice %141 {offsets = [0, 0], sizes = [8, 32], strides = [1, 1]} : vector<8x128xf32> to vector<8x32xf32>
    %143 = vector.extract_strided_slice %141 {offsets = [0, 32], sizes = [8, 32], strides = [1, 1]} : vector<8x128xf32> to vector<8x32xf32>
    %144 = vector.extract_strided_slice %141 {offsets = [0, 64], sizes = [8, 32], strides = [1, 1]} : vector<8x128xf32> to vector<8x32xf32>
    %145 = vector.extract_strided_slice %141 {offsets = [0, 96], sizes = [8, 32], strides = [1, 1]} : vector<8x128xf32> to vector<8x32xf32>
    %146 = arith.mulf %143, %129 : vector<8x32xf32>
    %147 = arith.mulf %142, %144 : vector<8x32xf32>
    %148 = arith.addf %146, %147 : vector<8x32xf32>
    %149 = math.tanh %148 : vector<8x32xf32>
    %150 = arith.mulf %145, %149 : vector<8x32xf32>
    %151 = vector.extract_strided_slice %5 {offsets = [56, 0], sizes = [8, 128], strides = [1, 1]} : vector<64x128xf32> to vector<8x128xf32>
    %cst_32 = arith.constant dense<0.000000e+00> : vector<8x128xf32>
    %152 = tpu.matmul %150, %6, %cst_32 {dimension_numbers = #tpu.dot_dimension_numbers<[1], [0], [0], [1], [0, 0, 1, 1], [], []>} : vector<8x32xf32>, vector<32x128xf32>, vector<8x128xf32> -> vector<8x128xf32>
    %153 = arith.addf %151, %152 : vector<8x128xf32>
    %154 = arith.mulf %153, %15 : vector<8x128xf32>
    %155 = math.tanh %154 : vector<8x128xf32>
    %cst_33 = arith.constant 5.000000e-01 : f32
    %156 = vector.broadcast %cst_33 : f32 to vector<8x128xf32>
    %157 = arith.mulf %156, %155 : vector<8x128xf32>
    %cst_34 = arith.constant 5.000000e-01 : f32
    %158 = vector.broadcast %cst_34 : f32 to vector<8x128xf32>
    %159 = arith.addf %157, %158 : vector<8x128xf32>
    %160 = arith.select %12, %155, %159 : vector<8x128xi1>, vector<8x128xf32>
    %161 = vector.extract_strided_slice %160 {offsets = [0, 0], sizes = [8, 32], strides = [1, 1]} : vector<8x128xf32> to vector<8x32xf32>
    %162 = vector.extract_strided_slice %160 {offsets = [0, 32], sizes = [8, 32], strides = [1, 1]} : vector<8x128xf32> to vector<8x32xf32>
    %163 = vector.extract_strided_slice %160 {offsets = [0, 64], sizes = [8, 32], strides = [1, 1]} : vector<8x128xf32> to vector<8x32xf32>
    %164 = vector.extract_strided_slice %160 {offsets = [0, 96], sizes = [8, 32], strides = [1, 1]} : vector<8x128xf32> to vector<8x32xf32>
    %165 = arith.mulf %162, %148 : vector<8x32xf32>
    %166 = arith.mulf %161, %163 : vector<8x32xf32>
    %167 = arith.addf %165, %166 : vector<8x32xf32>
    %168 = math.tanh %167 : vector<8x32xf32>
    %169 = arith.mulf %164, %168 : vector<8x32xf32>
    %c0_35 = arith.constant 0 : index
    %c0_36 = arith.constant 0 : index
    %170 = vector.load %arg4[%c0_35, %c0_36] : memref<32x4xf32, #tpu.memory_space<vmem>>, vector<32x4xf32>
    %cst_37 = arith.constant dense<0.000000e+00> : vector<8x4xf32>
    %171 = tpu.matmul %169, %170, %cst_37 {dimension_numbers = #tpu.dot_dimension_numbers<[1], [0], [0], [1], [0, 0, 1, 1], [], []>} : vector<8x32xf32>, vector<32x4xf32>, vector<8x4xf32> -> vector<8x4xf32>
    %c0_38 = arith.constant 0 : index
    %c0_39 = arith.constant 0 : index
    %172 = vector.load %arg5[%c0_38, %c0_39] : memref<1x4xf32, #tpu.memory_space<vmem>>, vector<1x4xf32>
    %173 = vector.broadcast %172 : vector<1x4xf32> to vector<8x4xf32>
    %174 = arith.addf %171, %173 : vector<8x4xf32>
    %c0_40 = arith.constant 0 : index
    %c0_41 = arith.constant 0 : index
    %175 = vector.load %arg6[%c0_40, %c0_41] : memref<8x4xf32, #tpu.memory_space<vmem>>, vector<8x4xf32>
    tpu.vector_store %arg6[%c0_40, %c0_41], %174 {strides = array<i32>} : memref<8x4xf32, #tpu.memory_space<vmem>>, vector<8x4xf32>,
    return
  }
}

</mosaic_0001>

<bundles_post_ra>
// kernel: weather_lstm_forward.1
= control target key start
LH: loop header
LB: loop body
LE: loop exit
PB: predicated region body
PF: predicated region fallthrough
CT: control target
= control target key end

     0   :  { %vm64_vm0 = vcmask 1043456   ;;  %vm39_vm1 = vcmask 31744   ;;  %v1335_v0 = vmov 0.0|0.0   ;;  %vm1336_vm2 = vmmov 0   ;;  %s1340_s11 = smov 32   ;;  %s1598_s2 = inlined_call_operand.vmem [shape: f32[32,128], index: 2, kind: input, shape index: {}]   ;;  %s1599_s1 = inlined_call_operand.vmem [shape: f32[4,128], index: 1, kind: input, shape index: {}]   ;;  %s1600_s0 = inlined_call_operand.vmem [shape: f32[64,4], index: 0, kind: input, shape index: {}]   ;;  %s1601_s3 = inlined_call_operand.vmem [shape: f32[1,128], index: 3, kind: input, shape index: {}]   ;;  %s1602_s4 = inlined_call_operand.vmem [shape: f32[32,4], index: 4, kind: input, shape index: {}]   ;;  %s1603_s5 = inlined_call_operand.vmem [shape: f32[1,4], index: 5, kind: input, shape index: {}]   ;;  %s1604_s6 = inlined_call_operand.vmem [shape: f32[8,4], index: 6, kind: output, shape index: {}]  }
   0x1   :  { %1243 = vmatprep.subr.bf16.mxu1 %v1335_v0  ;;  %v173_v1 = vld [vmem:[%s1598_s2] sm:$0xff]  ;;  %v174_v2 = vld [vmem:[%s1598_s2 + $0x8] sm:$0xff]  ;;  %v175_v7 = vld [vmem:[%s1598_s2 + $0x10] sm:$0xff]  ;;  %v1337_v8 = vmov 0.0   ;;  %v177_v11 = vlaneseq  ;;  %v1338_v18 = vmov 0.5   ;;  %vm183_vm6 = vcmask 261120  }
   0x2   :  { %v31_v3 = vld [vmem:[%s1599_s1] sm:$0xf]  ;;  %v1386_v4 = vpack.c.bf16 %v174_v2, %v173_v1  ;;  %v24_v6 = vld [vmem:[%s1600_s0 + $0x8] sm:$0xff]  ;;  %1152 = vmatprep.mubr.msk.f32.mxu1 %vm1336_vm2, %v1337_v8  ;;  %v176_v9 = vld [vmem:[%s1598_s2 + $0x18] sm:$0xff] }
   0x3   :  { %1130 = vmatprep.subr.msk.mxu0 %vm64_vm0, %v31_v3  ;;  %v23_v5 = vld [vmem:[%s1600_s0] sm:$0xff]  ;;  %v1407_v10 = vpack.c.bf16 %v176_v9, %v175_v7  ;;  %v178_v12 = vand.u32 127, %v177_v11  ;;  %v25_v51 = vld [vmem:[%s1600_s0 + $0x10] sm:$0xff]  ;;  %v26_v52 = vld [vmem:[%s1600_s0 + $0x18] sm:$0xff] }
   0x4   :  { %1131 = vmatpush3.msk.msra.mxu0 %vm64_vm0, %v31_v3  ;;  %1132 = vmatprep.mubr.msk.f32.mxu0 %vm39_vm1, %v23_v5  ;;  %v1427_v14 = vld [vmem:[%s1601_s3] ss:$0 sm:$0xff]  ;;  %s1339_s3 = smov 64   ;;  %v28_v54 = vld [vmem:[%s1600_s0 + $0x28] sm:$0xff]  ;;  %v29_v55 = vld [vmem:[%s1600_s0 + $0x30] sm:$0xff] }
   0x5   :  { %1245 = vmatpush3.bf16.msra.mxu1 %v1386_v4  ;;  %1133 = vmatmul.mubr.msk.f32.vlgmr.msra.gmra.mrb[0].mxu0 %vm39_vm1, %v24_v6  ;;  %vm179_vm3 = vcmp.ge.s32.totalorder %v178_v12, 64  ;;  %vm180_vm4 = vcmp.lt.s32.totalorder %v178_v12, 96  ;;  %v27_v53 = vld [vmem:[%s1600_s0 + $0x20] sm:$0xff]  ;;  %v30_v56 = vld [vmem:[%s1600_s0 + $0x38] sm:$0xff]  ;;  %v968_v17 = vld [vmem:[%s1602_s4 + $0x10] sm:$0xff] }
   0x6   :  { %1246 = vmatprep.subr.bf16.mxu1 %v1335_v0  ;;  %1255 = vmatprep.subr.bf16.mxu0 %v1335_v0  ;;  %vm1430_vm5 = vmand %vm179_vm3, %vm180_vm4 }
   0x7   :  { %1257 = vmatpush3.bf16.msra.mxu0 %v1386_v4  ;;  %v1436_v19 = vsel %vm1430_vm5, 1.0, %v1338_v18  ;;  %1135 = vmatprep.mubr.msk.f32.mxu0 %vm39_vm1, %v25_v51 }
   0x8   :  { %1258 = vmatprep.subr.bf16.mxu0 %v1335_v0 }
   0x9   :  { %1248 = vmatpush3.bf16.msra.mxu1 %v1407_v10  ;;  %1136 = vmatmul.mubr.msk.f32.gmra.mrb[2].mxu0 %vm39_vm1, %v26_v52 }
   0xa   :  { %1249 = vmatprep.subr.bf16.mxu1 %v1335_v0  ;;  %1138 = vmatprep.mubr.msk.f32.mxu0 %vm39_vm1, %v27_v53 }
   0xb   :  { %1260 = vmatpush3.bf16.msra.mxu0 %v1407_v10 }
   0xc   :  { %1153 = vmatmul.mubr.f32.vlgmr.msra.gmra.mrb[0].mxu1 %v1337_v8  ;;  %1267 = vmatprep.subr.bf16.mxu0 %v1335_v0 }
   0xd   :  { %1251 = vmatpush3.bf16.msra.mxu1 %v1386_v4  ;;  %1163 = vmatprep.mubr.msk.f32.mxu1 %vm1336_vm2, %v1337_v8 }
   0xe   :  { %1252 = vmatprep.subr.bf16.mxu1 %v1335_v0  ;;  %1139 = vmatmul.mubr.msk.f32.gmra.mrb[4].mxu0 %vm39_vm1, %v28_v54 }
   0xf   :  { %1141 = vmatprep.mubr.msk.f32.mxu0 %vm39_vm1, %v29_v55 }
  0x11   :  { %1254 = vmatpush3.bf16.msra.mxu1 %v1407_v10 }
  0x12   :  { %1261 = vmatprep.subr.bf16.mxu1 %v1335_v0  ;;  %1142 = vmatmul.mubr.msk.f32.gmra.mrb[6].mxu0 %vm39_vm1, %v30_v56 }
  0x13   :  { %1174 = vmatprep.mubr.msk.f32.mxu0 %vm1336_vm2, %v1337_v8 }
  0xd8   :  { %v1134_v13 = vpop.f32.mrb[0].mxu0 }
  0xd9   :  { %v134_v15 = vpop.f32.mrb[1].mxu0  ;;  %v140_v37 = vadd.f32 %v1134_v13, %v1427_v14 }
  0xda   :  { %v135_v16 = vadd.f32 %v1427_v14, %v134_v15 }
  0xdc   :  { %v1137_v60 = vpop.f32.mrb[2].mxu0 }
  0xdd   :  { %v144_v61 = vpop.f32.mrb[3].mxu0 }
  0xde   :  { %v145_v5 = vadd.f32 %v1427_v14, %v144_v61 }
  0xdf   :  { %v253_v20 = vpop.f32.mrb[0].mxu1 }
  0xe0   :  { %v257_v21 = vadd.f32 %v253_v20, %v135_v16  ;;  %v1154_v22 = vpop.f32.mrb[1].mxu1 }
  0xe1   :  { %v1486_v62 = vpop.f32.mrb[4].mxu0 }
  0xe2   :  { %v258_v23 = vmul.f32 %v257_v21, %v1436_v19  ;;  %v1488_v63 = vpop.f32.mrb[5].mxu0 }
  0xe4   :  { %1303 = vtanh.f32 %v258_v23 }
  0xe5   :  { %v1490_v1 = vpop.f32.mrb[6].mxu0 }
  0xe6   :  { %v1492_v2 = vpop.f32.mrb[7].mxu0 }
  0xee   :  { %v1304_v24 = vpop.eup %1303 }
  0xef   :  { %v260_v25 = vmul.f32 0.5, %v1304_v24 }
  0xf1   :  { %v261_v26 = vadd.f32 0.5, %v260_v25 }
  0xf3   :  { %v262_v27 = vsel %vm1430_vm5, %v1304_v24, %v261_v26 }
  0xf4   :  { %265 = vrot.lane.b32.xlu0 %v262_v27, %s1339_s3  ;;  %v263_v30 = vmul.f32 0.0, %v262_v27 }
 0x166   :  { %v266_v28 = vpop.permute.xlu0 %265 }
 0x167   :  { %v268_v29 = vmul.f32 %v266_v28, %v262_v27  ;;  %v150_v28 = vadd.f32 %v1137_v60, %v1427_v14 }
 0x169   :  { %270 = vrot.lane.b32.xlu0 %v268_v29, %s1340_s11 }
 0x1db   :  { %v271_v31 = vpop.permute.xlu0 %270 }
 0x1dc   :  { %v273_v32 = vadd.f32 %v271_v31, %v263_v30 }
 0x1de   :  { %1305 = vtanh.f32 %v273_v32 }
 0x1e8   :  { %v1306_v33 = vpop.eup %1305 }
 0x1e9   :  { %276 = vrot.lane.b32.xlu1 %v1306_v33, %s1339_s3 }
 0x25b   :  { %v277_v34 = vpop.permute.xlu1 %276 }
 0x25c   :  { %v279_v35 = vmul.f32 %v277_v34, %v262_v27 }
 0x25e   :  { %281 = vrot.lane.b32.xlu1 %v279_v35, %s1340_s11 }
 0x2d0   :  { %v282_v36 = vpop.permute.xlu1 %281 }
 0x2d1   :  { %1164 = vmatmul.mubr.msk.f32.vlgmr.msra.gmra.mrb[2].mxu1 %vm183_vm6, %v282_v36 }
 0x2d2   :  { %1263 = vmatpush3.bf16.msra.mxu1 %v1386_v4  ;;  %1185 = vmatprep.mubr.msk.f32.mxu1 %vm1336_vm2, %v1337_v8 }
 0x2d3   :  { %1264 = vmatprep.subr.bf16.mxu1 %v1335_v0 }
 0x2d6   :  { %1266 = vmatpush3.bf16.msra.mxu1 %v1407_v10 }
 0x2d7   :  { %1273 = vmatprep.subr.bf16.mxu1 %v1335_v0 }
 0x3a4   :  { %v351_v38 = vpop.f32.mrb[2].mxu1 }
 0x3a5   :  { %v355_v39 = vadd.f32 %v351_v38, %v140_v37  ;;  %v1165_v40 = vpop.f32.mrb[3].mxu1 }
 0x3a7   :  { %v356_v41 = vmul.f32 %v355_v39, %v1436_v19 }
 0x3a9   :  { %1307 = vtanh.f32 %v356_v41 }
 0x3b3   :  { %v1308_v42 = vpop.eup %1307 }
 0x3b4   :  { %v358_v43 = vmul.f32 0.5, %v1308_v42 }
 0x3b6   :  { %v359_v44 = vadd.f32 0.5, %v358_v43 }
 0x3b8   :  { %v360_v45 = vsel %vm1430_vm5, %v1308_v42, %v359_v44 }
 0x3b9   :  { %363 = vrot.lane.b32.xlu0 %v360_v45, %s1339_s3  ;;  %v361_v48 = vmul.f32 %v360_v45, %v273_v32 }
 0x42b   :  { %v364_v46 = vpop.permute.xlu0 %363 }
 0x42c   :  { %v366_v47 = vmul.f32 %v364_v46, %v360_v45  ;;  %v155_v46 = vadd.f32 %v1427_v14, %v1488_v63 }
 0x42e   :  { %368 = vrot.lane.b32.xlu1 %v366_v47, %s1340_s11 }
 0x4a0   :  { %v369_v49 = vpop.permute.xlu1 %368 }
 0x4a1   :  { %v371_v50 = vadd.f32 %v369_v49, %v361_v48 }
 0x4a3   :  { %1309 = vtanh.f32 %v371_v50 }
 0x4ad   :  { %v1310_v57 = vpop.eup %1309 }
 0x4ae   :  { %374 = vrot.lane.b32.xlu0 %v1310_v57, %s1339_s3 }
 0x520   :  { %v375_v58 = vpop.permute.xlu0 %374 }
 0x521   :  { %v377_v59 = vmul.f32 %v375_v58, %v360_v45 }
 0x523   :  { %379 = vrot.lane.b32.xlu1 %v377_v59, %s1340_s11 }
 0x595   :  { %v380_v3 = vpop.permute.xlu1 %379 }
 0x596   :  { %1175 = vmatmul.mubr.msk.f32.vlgmr.msra.gmra.mrb[8].mxu0 %vm183_vm6, %v380_v3 }
 0x597   :  { %1269 = vmatpush3.bf16.msra.mxu0 %v1386_v4  ;;  %1196 = vmatprep.mubr.msk.f32.mxu0 %vm1336_vm2, %v1337_v8 }
 0x598   :  { %1270 = vmatprep.subr.bf16.mxu0 %v1335_v0 }
 0x59b   :  { %1272 = vmatpush3.bf16.msra.mxu0 %v1407_v10 }
 0x59c   :  { %1279 = vmatprep.subr.bf16.mxu0 %v1335_v0 }
 0x669   :  { %v449_v6 = vpop.f32.mrb[8].mxu0 }
 0x66a   :  { %v453_v7 = vadd.f32 %v449_v6, %v145_v5  ;;  %v1176_v9 = vpop.f32.mrb[9].mxu0  ;;  %v160_v5 = vadd.f32 %v1486_v62, %v1427_v14 }
 0x66c   :  { %v454_v11 = vmul.f32 %v453_v7, %v1436_v19 }
 0x66e   :  { %1311 = vtanh.f32 %v454_v11 }
 0x678   :  { %v1312_v12 = vpop.eup %1311 }
 0x679   :  { %v456_v13 = vmul.f32 0.5, %v1312_v12 }
 0x67b   :  { %v457_v15 = vadd.f32 0.5, %v456_v13 }
 0x67d   :  { %v458_v16 = vsel %vm1430_vm5, %v1312_v12, %v457_v15 }
 0x67e   :  { %461 = vrot.lane.b32.xlu0 %v458_v16, %s1339_s3  ;;  %v459_v21 = vmul.f32 %v458_v16, %v371_v50 }
 0x6f0   :  { %v462_v18 = vpop.permute.xlu0 %461 }
 0x6f1   :  { %v464_v20 = vmul.f32 %v462_v18, %v458_v16 }
 0x6f3   :  { %466 = vrot.lane.b32.xlu1 %v464_v20, %s1340_s11 }
 0x765   :  { %v467_v22 = vpop.permute.xlu1 %466 }
 0x766   :  { %v469_v23 = vadd.f32 %v467_v22, %v459_v21 }
 0x768   :  { %1313 = vtanh.f32 %v469_v23 }
 0x772   :  { %v1314_v24 = vpop.eup %1313 }
 0x773   :  { %472 = vrot.lane.b32.xlu0 %v1314_v24, %s1339_s3 }
 0x7e5   :  { %v473_v25 = vpop.permute.xlu0 %472 }
 0x7e6   :  { %v475_v26 = vmul.f32 %v473_v25, %v458_v16  ;;  %v165_v25 = vadd.f32 %v1427_v14, %v1492_v2 }
 0x7e8   :  { %477 = vrot.lane.b32.xlu1 %v475_v26, %s1340_s11 }
 0x85a   :  { %v478_v27 = vpop.permute.xlu1 %477 }
 0x85b   :  { %1186 = vmatmul.mubr.msk.f32.vlgmr.msra.gmra.mrb[4].mxu1 %vm183_vm6, %v478_v27 }
 0x85c   :  { %1275 = vmatpush3.bf16.msra.mxu1 %v1386_v4  ;;  %1207 = vmatprep.mubr.msk.f32.mxu1 %vm1336_vm2, %v1337_v8 }
 0x85d   :  { %1276 = vmatprep.subr.bf16.mxu1 %v1335_v0 }
 0x860   :  { %1278 = vmatpush3.bf16.msra.mxu1 %v1407_v10 }
 0x861   :  { %1285 = vmatprep.subr.bf16.mxu1 %v1335_v0 }
 0x92e   :  { %v547_v29 = vpop.f32.mrb[4].mxu1 }
 0x92f   :  { %v551_v30 = vadd.f32 %v547_v29, %v150_v28  ;;  %v1187_v31 = vpop.f32.mrb[5].mxu1 }
 0x931   :  { %v552_v32 = vmul.f32 %v551_v30, %v1436_v19 }
 0x933   :  { %1315 = vtanh.f32 %v552_v32 }
 0x93d   :  { %v1316_v33 = vpop.eup %1315 }
 0x93e   :  { %v554_v34 = vmul.f32 0.5, %v1316_v33 }
 0x940   :  { %v555_v35 = vadd.f32 0.5, %v554_v34 }
 0x942   :  { %v556_v36 = vsel %vm1430_vm5, %v1316_v33, %v555_v35 }
 0x943   :  { %559 = vrot.lane.b32.xlu0 %v556_v36, %s1339_s3  ;;  %v557_v39 = vmul.f32 %v556_v36, %v469_v23 }
 0x9b5   :  { %v560_v37 = vpop.permute.xlu0 %559 }
 0x9b6   :  { %v562_v38 = vmul.f32 %v560_v37, %v556_v36 }
 0x9b8   :  { %564 = vrot.lane.b32.xlu1 %v562_v38, %s1340_s11 }
 0xa2a   :  { %v565_v40 = vpop.permute.xlu1 %564 }
 0xa2b   :  { %v567_v41 = vadd.f32 %v565_v40, %v557_v39 }
 0xa2d   :  { %1317 = vtanh.f32 %v567_v41 }
 0xa37   :  { %v1318_v42 = vpop.eup %1317 }
 0xa38   :  { %570 = vrot.lane.b32.xlu0 %v1318_v42, %s1339_s3 }
 0xaaa   :  { %v571_v43 = vpop.permute.xlu0 %570 }
 0xaab   :  { %v573_v44 = vmul.f32 %v571_v43, %v556_v36 }
 0xaad   :  { %575 = vrot.lane.b32.xlu1 %v573_v44, %s1340_s11 }
 0xb1f   :  { %v576_v45 = vpop.permute.xlu1 %575 }
 0xb20   :  { %1197 = vmatmul.mubr.msk.f32.vlgmr.msra.gmra.mrb[10].mxu0 %vm183_vm6, %v576_v45 }
 0xb21   :  { %1281 = vmatpush3.bf16.msra.mxu0 %v1386_v4  ;;  %1218 = vmatprep.mubr.msk.f32.mxu0 %vm1336_vm2, %v1337_v8 }
 0xb22   :  { %1282 = vmatprep.subr.bf16.mxu0 %v1335_v0 }
 0xb25   :  { %1284 = vmatpush3.bf16.msra.mxu0 %v1407_v10 }
 0xb26   :  { %1291 = vmatprep.subr.bf16.mxu0 %v1335_v0 }
 0xbf3   :  { %v645_v47 = vpop.f32.mrb[10].mxu0 }
 0xbf4   :  { %v649_v48 = vadd.f32 %v645_v47, %v155_v46  ;;  %v1198_v49 = vpop.f32.mrb[11].mxu0 }
 0xbf6   :  { %v650_v50 = vmul.f32 %v649_v48, %v1436_v19 }
 0xbf8   :  { %1319 = vtanh.f32 %v650_v50 }
 0xc02   :  { %v1320_v51 = vpop.eup %1319 }
 0xc03   :  { %v652_v52 = vmul.f32 0.5, %v1320_v51 }
 0xc05   :  { %v653_v53 = vadd.f32 0.5, %v652_v52 }
 0xc07   :  { %v654_v54 = vsel %vm1430_vm5, %v1320_v51, %v653_v53  ;;  %v967_v53 = vld [vmem:[%s1602_s4 + $0x8] sm:$0xff] }
 0xc08   :  { %657 = vrot.lane.b32.xlu0 %v654_v54, %s1339_s3  ;;  %v655_v57 = vmul.f32 %v654_v54, %v567_v41  ;;  %v170_v41 = vadd.f32 %v1490_v1, %v1427_v14 }
 0xc7a   :  { %v658_v55 = vpop.permute.xlu0 %657 }
 0xc7b   :  { %v660_v56 = vmul.f32 %v658_v55, %v654_v54  ;;  %v969_v55 = vld [vmem:[%s1602_s4 + $0x18] sm:$0xff] }
 0xc7d   :  { %662 = vrot.lane.b32.xlu1 %v660_v56, %s1340_s11  ;;  %v1295_v56 = vpack.c.bf16 %v969_v55, %v968_v17 }
 0xcef   :  { %v663_v58 = vpop.permute.xlu1 %662 }
 0xcf0   :  { %v665_v59 = vadd.f32 %v663_v58, %v655_v57 }
 0xcf2   :  { %1321 = vtanh.f32 %v665_v59 }
 0xcfc   :  { %v1322_v60 = vpop.eup %1321 }
 0xcfd   :  { %668 = vrot.lane.b32.xlu0 %v1322_v60, %s1339_s3 }
 0xd6f   :  { %v669_v61 = vpop.permute.xlu0 %668 }
 0xd70   :  { %v671_v63 = vmul.f32 %v669_v61, %v654_v54  ;;  %v1074_v61 = vld [vmem:[%s1603_s5] ss:$0 sm:$0xff] }
 0xd72   :  { %673 = vrot.lane.b32.xlu1 %v671_v63, %s1340_s11 }
 0xde4   :  { %v674_v3 = vpop.permute.xlu1 %673 }
 0xde5   :  { %1208 = vmatmul.mubr.msk.f32.vlgmr.msra.gmra.mrb[6].mxu1 %vm183_vm6, %v674_v3 }
 0xde6   :  { %1287 = vmatpush3.bf16.msra.mxu1 %v1386_v4  ;;  %1229 = vmatprep.mubr.msk.f32.mxu1 %vm1336_vm2, %v1337_v8 }
 0xde7   :  { %1288 = vmatprep.subr.bf16.mxu1 %v1335_v0 }
 0xdea   :  { %1290 = vmatpush3.bf16.msra.mxu1 %v1407_v10 }
 0xeb8   :  { %v743_v6 = vpop.f32.mrb[6].mxu1 }
 0xeb9   :  { %v747_v7 = vadd.f32 %v743_v6, %v160_v5  ;;  %v1209_v9 = vpop.f32.mrb[7].mxu1 }
 0xebb   :  { %v748_v11 = vmul.f32 %v747_v7, %v1436_v19 }
 0xebd   :  { %1323 = vtanh.f32 %v748_v11 }
 0xec7   :  { %v1324_v12 = vpop.eup %1323 }
 0xec8   :  { %v750_v13 = vmul.f32 0.5, %v1324_v12 }
 0xeca   :  { %v751_v15 = vadd.f32 0.5, %v750_v13 }
 0xecc   :  { %v752_v4 = vsel %vm1430_vm5, %v1324_v12, %v751_v15 }
 0xecd   :  { %755 = vrot.lane.b32.xlu0 %v752_v4, %s1339_s3  ;;  %v753_v10 = vmul.f32 %v752_v4, %v665_v59 }
 0xf3f   :  { %v756_v16 = vpop.permute.xlu0 %755 }
 0xf40   :  { %v758_v18 = vmul.f32 %v756_v16, %v752_v4 }
 0xf42   :  { %760 = vrot.lane.b32.xlu1 %v758_v18, %s1340_s11 }
 0xfb4   :  { %v761_v62 = vpop.permute.xlu1 %760 }
 0xfb5   :  { %v763_v20 = vadd.f32 %v761_v62, %v753_v10 }
 0xfb7   :  { %1325 = vtanh.f32 %v763_v20 }
 0xfc1   :  { %v1326_v21 = vpop.eup %1325 }
 0xfc2   :  { %766 = vrot.lane.b32.xlu0 %v1326_v21, %s1339_s3 }
0x1034   :  { %v767_v22 = vpop.permute.xlu0 %766 }
0x1035   :  { %v769_v23 = vmul.f32 %v767_v22, %v752_v4 }
0x1037   :  { %771 = vrot.lane.b32.xlu1 %v769_v23, %s1340_s11 }
0x10a9   :  { %v772_v24 = vpop.permute.xlu1 %771 }
0x10aa   :  { %1219 = vmatmul.mubr.msk.f32.vlgmr.msra.gmra.mrb[12].mxu0 %vm183_vm6, %v772_v24 }
0x10ab   :  { %1240 = vmatprep.mubr.msk.f32.mxu0 %vm1336_vm2, %v1337_v8 }
0x117d   :  { %v841_v26 = vpop.f32.mrb[12].mxu0 }
0x117e   :  { %v845_v27 = vadd.f32 %v841_v26, %v165_v25  ;;  %v1220_v28 = vpop.f32.mrb[13].mxu0 }
0x1180   :  { %v846_v29 = vmul.f32 %v845_v27, %v1436_v19 }
0x1182   :  { %1327 = vtanh.f32 %v846_v29 }
0x118c   :  { %v1328_v30 = vpop.eup %1327 }
0x118d   :  { %v848_v31 = vmul.f32 0.5, %v1328_v30 }
0x118f   :  { %v849_v32 = vadd.f32 0.5, %v848_v31 }
0x1191   :  { %v850_v33 = vsel %vm1430_vm5, %v1328_v30, %v849_v32 }
0x1192   :  { %853 = vrot.lane.b32.xlu0 %v850_v33, %s1339_s3  ;;  %v851_v8 = vmul.f32 %v850_v33, %v763_v20 }
0x1204   :  { %v854_v34 = vpop.permute.xlu0 %853 }
0x1205   :  { %v856_v35 = vmul.f32 %v854_v34, %v850_v33 }
0x1207   :  { %858 = vrot.lane.b32.xlu1 %v856_v35, %s1340_s11 }
0x1279   :  { %v859_v2 = vpop.permute.xlu1 %858 }
0x127a   :  { %v861_v36 = vadd.f32 %v859_v2, %v851_v8 }
0x127c   :  { %1329 = vtanh.f32 %v861_v36 }
0x1286   :  { %v1330_v37 = vpop.eup %1329 }
0x1287   :  { %864 = vrot.lane.b32.xlu0 %v1330_v37, %s1339_s3 }
0x12f9   :  { %v865_v38 = vpop.permute.xlu0 %864 }
0x12fa   :  { %v867_v39 = vmul.f32 %v865_v38, %v850_v33 }
0x12fc   :  { %869 = vrot.lane.b32.xlu1 %v867_v39, %s1340_s11 }
0x136e   :  { %v870_v40 = vpop.permute.xlu1 %869 }
0x136f   :  { %1230 = vmatmul.mubr.msk.f32.vlgmr.msra.gmra.mrb[8].mxu1 %vm183_vm6, %v870_v40 }
0x1442   :  { %v939_v42 = vpop.f32.mrb[8].mxu1 }
0x1443   :  { %v943_v43 = vadd.f32 %v939_v42, %v170_v41  ;;  %v1231_v44 = vpop.f32.mrb[9].mxu1 }
0x1445   :  { %v944_v45 = vmul.f32 %v943_v43, %v1436_v19  ;;  %v966_v19 = vld [vmem:[%s1602_s4] sm:$0xff] }
0x1446   :  { %v1292_v54 = vpack.c.bf16 %v967_v53, %v966_v19 }
0x1447   :  { %1331 = vtanh.f32 %v944_v45 }
0x1448   :  { %1293 = vmatpush3.bf16.msra.mxu0 %v1292_v54 }
0x1449   :  { %1294 = vmatprep.subr.bf16.mxu0 %v1335_v0 }
0x144c   :  { %1296 = vmatpush3.bf16.msra.mxu0 %v1295_v56 }
0x1451   :  { %v1332_v46 = vpop.eup %1331 }
0x1452   :  { %v946_v47 = vmul.f32 0.5, %v1332_v46 }
0x1454   :  { %v947_v48 = vadd.f32 0.5, %v946_v47 }
0x1456   :  { %v948_v49 = vsel %vm1430_vm5, %v1332_v46, %v947_v48 }
0x1457   :  { %951 = vrot.lane.b32.xlu0 %v948_v49, %s1339_s3  ;;  %v949_v52 = vmul.f32 %v948_v49, %v861_v36 }
0x14c9   :  { %v952_v50 = vpop.permute.xlu0 %951 }
0x14ca   :  { %v954_v51 = vmul.f32 %v952_v50, %v948_v49 }
0x14cc   :  { %956 = vrot.lane.b32.xlu1 %v954_v51, %s1340_s11 }
0x153e   :  { %v957_v14 = vpop.permute.xlu1 %956 }
0x153f   :  { %v959_v1 = vadd.f32 %v957_v14, %v949_v52 }
0x1541   :  { %1333 = vtanh.f32 %v959_v1 }
0x154b   :  { %v1334_v57 = vpop.eup %1333 }
0x154c   :  { %962 = vrot.lane.b32.xlu0 %v1334_v57, %s1339_s3 }
0x15be   :  { %v963_v58 = vpop.permute.xlu0 %962 }
0x15bf   :  { %v965_v59 = vmul.f32 %v963_v58, %v948_v49 }
0x15c1   :  { %978 = vrot.lane.b32.xlu1 %v965_v59, %s1340_s11 }
0x1633   :  { %v979_v60 = vpop.permute.xlu1 %978 }
0x1634   :  { %1241 = vmatmul.mubr.msk.f32.vlgmr.msra.gmra.mrb[14].mxu0 %vm183_vm6, %v979_v60 }
0x1707   :  { %v1048_v63 = vpop.f32.mrb[14].mxu0 }
0x1708   :  { %v1049_v3 = vadd.f32 %v1074_v61, %v1048_v63  ;;  %v1242_v5 = vpop.f32.mrb[15].mxu0 }
0x170a   :  { %1052 = vst.msk [vmem:[%s1604_s6] sm:$0xff] %vm39_vm1, %v1049_v3 }

</bundles_post_ra>
